<compile_context>
chip_gen: v6e
topology: v6e:2x2x1
jax: 0.10.0
libtpu: 0.0.40
codegen_flags: <defaults>
</compile_context>

<pallas_src>
import jax
import jax.numpy as jnp
from jax import lax
from jax.experimental import pallas as pl
from jax.experimental.pallas import tpu as pltpu

LANE = 128


def _round_up(n, m):
    return ((n + m - 1) // m) * m


# ----------------------------------------------------------------------------
# Kernel 1: 3x3 conv (pad=1) + bias + ReLU -> global-average-pool
# One grid step == one block of B_blk images; the feature map never hits HBM.
# ----------------------------------------------------------------------------
def conv_gap_kernel(x_ref, wc_ref, bc_ref, feat_ref):
    # x_ref  : (B_blk, H+2, W, 3C) bf16  dj-interleaved, 1-row zero halo
    # wc_ref : (9C, Fp)            bf16  conv weights, (di,dj,c)-major K
    # bc_ref : (1, Fp)             f32   conv bias (zero-padded)
    # feat_ref: (B_blk, Fp)        f32   pooled features (lane-dense)
    Bb, Hp2, W, C3 = x_ref.shape
    H = Hp2 - 2
    Fp = wc_ref.shape[-1]

    # Row-chunked spatial reduction keeps the live f32 tile at (Bb*TH*W, Fp).
    TH = next(t for t in (8, 4, 2, 1) if H % t == 0)
    n_chunks = H // TH
    M = Bb * TH * W
    inv_hw = 1.0 / float(H * W)

    # Hoisted out of the chunk loop (review: no per-chunk bias re-broadcast).
    bias = bc_ref[...]                      # (1, Fp) f32

    def chunk(r, pooled):
        r0 = r * TH
        # K-fold: three row-shifted (di) views of the dj-interleaved input,
        # concatenated along the minor axis -> K = 9*C, ONE matmul per chunk.
        taps = [x_ref[:, pl.ds(r0 + di, TH), :, :] for di in range(3)]
        slab = jnp.concatenate(taps, axis=-1).reshape(M, 3 * C3)   # bf16 (M, 9C)
        acc = jnp.dot(slab, wc_ref[...],
                      preferred_element_type=jnp.float32)          # f32 (M, Fp)
        act = jnp.maximum(acc + bias, 0.0)                         # bias + ReLU (f32)
        return pooled + jnp.sum(act.reshape(Bb, TH * W, Fp), axis=1)

    pooled = lax.fori_loop(0, n_chunks, chunk,
                           jnp.zeros((Bb, Fp), jnp.float32))
    feat_ref[...] = pooled * inv_hw         # global average pool


# ----------------------------------------------------------------------------
# Kernel 2: Linear classifier over the whole batch (M = B).
# ----------------------------------------------------------------------------
def classifier_kernel(f_ref, wf_ref, bf_ref, o_ref):
    # f_ref: (Bp, Fp) f32, wf_ref: (Fp, Tp) f32, bf_ref: (1, Tp) f32
    logits = jnp.dot(f_ref[...], wf_ref[...], preferred_element_type=jnp.float32)
    o_ref[...] = (logits + bf_ref[...]).astype(o_ref.dtype)


# ----------------------------------------------------------------------------
# Full ImageClassifier forward
# ----------------------------------------------------------------------------
def image_classifier_forward(x_nchw, params):
    """x_nchw: (B, C, H, W) f32 (PyTorch layout). Returns (B, num_targets) f32."""
    w_conv = params["w_conv"]          # (3, 3, C, F)
    b_conv = params["b_conv"]          # (F,)
    w_fc = params["w_fc"]              # (F, T)
    b_fc = params["b_fc"]              # (T,)

    B, C, H, W = x_nchw.shape
    F = w_conv.shape[-1]
    T = w_fc.shape[-1]
    Fp = _round_up(F, LANE)
    Tp = _round_up(T, LANE)
    Hp2 = H + 2
    C3 = 3 * C

    # Batch blocking: whole batch per grid step when small, else 8-image blocks.
    B_blk = B if B <= 8 else 8
    Bp = _round_up(B, B_blk)
    nb = Bp // B_blk

    # Glue (one fused XLA producer): NCHW -> NHWC, 1-px zero halo, dj-tap
    # interleave (lane-denser last dim = 3*C; makes the in-kernel K-fold a pure
    # row concat), cast to bf16 for the MXU.  ~3x copy of the small input.
    x_nhwc = jnp.transpose(x_nchw, (0, 2, 3, 1))
    xp = jnp.pad(x_nhwc, ((0, 0), (1, 1), (1, 1), (0, 0)))
    xi = jnp.concatenate([xp[:, :, dj:dj + W, :] for dj in range(3)], axis=-1)
    xi = xi.astype(jnp.bfloat16)                               # (B, Hp2, W, 3C)
    if Bp != B:
        xi = jnp.pad(xi, ((0, Bp - B), (0, 0), (0, 0), (0, 0)))

    # Conv weights folded tap-major into the contraction dim: (9C, Fp) bf16.
    wc = jnp.pad(w_conv.reshape(9 * C, F),
                 ((0, 0), (0, Fp - F))).astype(jnp.bfloat16)
    bc = jnp.pad(b_conv, (0, Fp - F)).reshape(1, Fp).astype(jnp.float32)

    cost = pl.CostEstimate(
        flops=2 * Bp * H * W * 9 * C * F,
        transcendentals=0,
        bytes_accessed=xi.size * 2 + wc.size * 2 + bc.size * 4 + Bp * Fp * 4,
    )

    feats = pl.pallas_call(
        conv_gap_kernel,
        out_shape=jax.ShapeDtypeStruct((Bp, Fp), jnp.float32),
        grid=(nb,),
        in_specs=[
            pl.BlockSpec((B_blk, Hp2, W, C3), lambda g: (g, 0, 0, 0)),
            # Constant-indexed weights/bias: single-buffered to halve resident VMEM.
            pl.BlockSpec((9 * C, Fp), lambda g: (0, 0), pipeline_mode=pl.Buffered(1)),
            pl.BlockSpec((1, Fp), lambda g: (0, 0), pipeline_mode=pl.Buffered(1)),
        ],
        out_specs=pl.BlockSpec((B_blk, Fp), lambda g: (g, 0)),
        compiler_params=pltpu.CompilerParams(
            dimension_semantics=("parallel",),
            vmem_limit_bytes=32 * 1024 * 1024,
        ),
        cost_estimate=cost,
    )(xi, wc, bc)

    # Classifier: one whole-batch matmul in a tiny second kernel (full-array blocks).
    wf = jnp.pad(w_fc, ((0, Fp - F), (0, Tp - T))).astype(jnp.float32)
    bf = jnp.pad(b_fc, (0, Tp - T)).reshape(1, Tp).astype(jnp.float32)
    logits = pl.pallas_call(
        classifier_kernel,
        out_shape=jax.ShapeDtypeStruct((Bp, Tp), jnp.float32),
    )(feats, wf, bf)

    return logits[:B, :T]   # strip batch/lane padding -> (B, num_targets)


# Pure-JAX reference of the same forward (f32), for a tolerance check.
def reference_forward(x_nchw, params):
    x = jnp.transpose(x_nchw, (0, 2, 3, 1))
    y = lax.conv_general_dilated(
        x, params["w_conv"], window_strides=(1, 1), padding="SAME",
        dimension_numbers=("NHWC", "HWIO", "NHWC"))
    y = jnp.maximum(y + params["b_conv"], 0.0)
    feats = jnp.mean(y, axis=(1, 2))
    return feats @ params["w_fc"] + params["b_fc"]


def init_params(key, in_ch, feature_dim, num_targets):
    k1, k2, k3, k4 = jax.random.split(key, 4)
    return {
        "w_conv": jax.random.normal(k1, (3, 3, in_ch, feature_dim), jnp.float32) * 0.05,
        "b_conv": jax.random.normal(k2, (feature_dim,), jnp.float32) * 0.01,
        "w_fc":   jax.random.normal(k3, (feature_dim, num_targets), jnp.float32) * 0.05,
        "b_fc":   jax.random.normal(k4, (num_targets,), jnp.float32) * 0.01,
    }


if __name__ == "__main__":
    key = jax.random.PRNGKey(0)
    kx, kp = jax.random.split(key)

    B, C, H, W = 2, 3, 16, 16         # small image batch (NCHW like PyTorch)
    feature_dim = 32                  # stand-in for backbone feature_dim
    num_targets = 5                   # args.vision_num_targets

    x = jax.random.normal(kx, (B, C, H, W), jnp.float32)
    params = init_params(kp, C, feature_dim, num_targets)

    pred = jax.block_until_ready(image_classifier_forward(x, params))
    assert pred.shape == (B, num_targets) and pred.dtype == jnp.float32

    ref = reference_forward(x, params)
    assert jnp.allclose(pred, ref, rtol=2e-2, atol=2e-2), "mismatch vs f32 reference"
    print("KERNEL_OK")
</pallas_src>

<mosaic_0001>
module attributes {stable_mosaic.version = 11 : i64} {
  func.func @conv_gap_kernel(%arg0: i32, %arg1: memref<2x18x16x9xbf16, #tpu.memory_space<vmem>>, %arg2: memref<27x128xbf16, #tpu.memory_space<vmem>>, %arg3: memref<1x128xf32, #tpu.memory_space<vmem>>, %arg4: memref<2x128xf32, #tpu.memory_space<vmem>>) attributes {dimension_semantics = [#tpu.dimension_semantics<parallel>], iteration_bounds = array<i64: 1>, scalar_prefetch = 0 : i64, scratch_operands = 0 : i64, tpu.core_type = #tpu.core_type<tc>, window_params = [{transform_indices = @transform_0, window_bounds = array<i64: 2, 18, 16, 9>}, {pipeline_mode = #tpu.pipeline_mode<synchronous>, transform_indices = @transform_1, window_bounds = array<i64: 27, 128>}, {pipeline_mode = #tpu.pipeline_mode<synchronous>, transform_indices = @transform_2, window_bounds = array<i64: 1, 128>}, {transform_indices = @transform_3, window_bounds = array<i64: 2, 128>}]} {
    %c0 = arith.constant 0 : index
    %c0_0 = arith.constant 0 : index
    %0 = vector.load %arg3[%c0, %c0_0] : memref<1x128xf32, #tpu.memory_space<vmem>>, vector<1x128xf32>
    %cst = arith.constant 0.000000e+00 : f32
    %1 = vector.broadcast %cst : f32 to vector<2x128xf32>
    %c0_i32 = arith.constant 0 : i32
    %c2_i32 = arith.constant 2 : i32
    %2 = arith.addi %c0_i32, %c2_i32 : i32
    %c1_i32 = arith.constant 1 : i32
    %3 = scf.for %arg5 = %c0_i32 to %2 step %c1_i32 iter_args(%arg6 = %1) -> (vector<2x128xf32>)  : i32 {
      %c8_i32 = arith.constant 8 : i32
      %7 = arith.muli %arg5, %c8_i32 : i32
      %c0_i32_5 = arith.constant 0 : i32
      %8 = arith.addi %7, %c0_i32_5 : i32
      %c0_6 = arith.constant 0 : index
      %9 = arith.index_cast %8 : i32 to index
      %c0_7 = arith.constant 0 : index
      %c0_8 = arith.constant 0 : index
      %10 = vector.load %arg1[%c0_6, %9, %c0_7, %c0_8] : memref<2x18x16x9xbf16, #tpu.memory_space<vmem>>, vector<2x8x16x9xbf16>
      %c1_i32_9 = arith.constant 1 : i32
      %11 = arith.addi %7, %c1_i32_9 : i32
      %c0_10 = arith.constant 0 : index
      %12 = arith.index_cast %11 : i32 to index
      %c0_11 = arith.constant 0 : index
      %c0_12 = arith.constant 0 : index
      %13 = vector.load %arg1[%c0_10, %12, %c0_11, %c0_12] : memref<2x18x16x9xbf16, #tpu.memory_space<vmem>>, vector<2x8x16x9xbf16>
      %c2_i32_13 = arith.constant 2 : i32
      %14 = arith.addi %7, %c2_i32_13 : i32
      %c0_14 = arith.constant 0 : index
      %15 = arith.index_cast %14 : i32 to index
      %c0_15 = arith.constant 0 : index
      %c0_16 = arith.constant 0 : index
      %16 = vector.load %arg1[%c0_14, %15, %c0_15, %c0_16] : memref<2x18x16x9xbf16, #tpu.memory_space<vmem>>, vector<2x8x16x9xbf16>
      %17 = tpu.concatenate %10, %13, %16 in 3 : vector<2x8x16x9xbf16>, vector<2x8x16x9xbf16>, vector<2x8x16x9xbf16> -> vector<2x8x16x27xbf16>
      %18 = vector.shape_cast %17 : vector<2x8x16x27xbf16> to vector<256x27xbf16>
      %c0_17 = arith.constant 0 : index
      %c0_18 = arith.constant 0 : index
      %19 = vector.load %arg2[%c0_17, %c0_18] : memref<27x128xbf16, #tpu.memory_space<vmem>>, vector<27x128xbf16>
      %cst_19 = arith.constant dense<0.000000e+00> : vector<256x128xf32>
      %20 = tpu.matmul %18, %19, %cst_19 {dimension_numbers = #tpu.dot_dimension_numbers<[1], [0], [0], [1], [0, 0, 1, 1], [], []>} : vector<256x27xbf16>, vector<27x128xbf16>, vector<256x128xf32> -> vector<256x128xf32>
      %21 = vector.broadcast %0 : vector<1x128xf32> to vector<256x128xf32>
      %22 = arith.addf %20, %21 : vector<256x128xf32>
      %cst_20 = arith.constant 0.000000e+00 : f32
      %23 = vector.broadcast %cst_20 : f32 to vector<256x128xf32>
      %24 = arith.maximumf %22, %23 : vector<256x128xf32>
      %25 = vector.shape_cast %24 : vector<256x128xf32> to vector<2x128x128xf32>
      %cst_21 = arith.constant dense<0.000000e+00> : vector<2x128xf32>
      %26 = vector.multi_reduction <add>, %25, %cst_21 [1] : vector<2x128x128xf32> to vector<2x128xf32>
      %27 = arith.addf %arg6, %26 : vector<2x128xf32>
      scf.yield %27 : vector<2x128xf32>
    }
    %c2_i32_1 = arith.constant 2 : i32
    %cst_2 = arith.constant 3.906250e-03 : f32
    %4 = vector.broadcast %cst_2 : f32 to vector<2x128xf32>
    %5 = arith.mulf %3, %4 : vector<2x128xf32>
    %c0_3 = arith.constant 0 : index
    %c0_4 = arith.constant 0 : index
    %6 = vector.load %arg4[%c0_3, %c0_4] : memref<2x128xf32, #tpu.memory_space<vmem>>, vector<2x128xf32>
    tpu.vector_store %arg4[%c0_3, %c0_4], %5 {strides = array<i32>} : memref<2x128xf32, #tpu.memory_space<vmem>>, vector<2x128xf32>,
    return
  }
  func.func @transform_0(%arg0: i32) -> (i32, i32, i32, i32) {
    %c0_i32 = arith.constant 0 : i32
    %c0_i32_0 = arith.constant 0 : i32
    %c0_i32_1 = arith.constant 0 : i32
    %c0_i32_2 = arith.constant 0 : i32
    return %arg0, %c0_i32, %c0_i32_0, %c0_i32_1 : i32, i32, i32, i32
  }
  func.func @transform_1(%arg0: i32) -> (i32, i32) {
    %c0_i32 = arith.constant 0 : i32
    %c0_i32_0 = arith.constant 0 : i32
    %c0_i32_1 = arith.constant 0 : i32
    return %c0_i32, %c0_i32_0 : i32, i32
  }
  func.func @transform_2(%arg0: i32) -> (i32, i32) {
    %c0_i32 = arith.constant 0 : i32
    %c0_i32_0 = arith.constant 0 : i32
    %c0_i32_1 = arith.constant 0 : i32
    return %c0_i32, %c0_i32_0 : i32, i32
  }
  func.func @transform_3(%arg0: i32) -> (i32, i32) {
    %c0_i32 = arith.constant 0 : i32
    %c0_i32_0 = arith.constant 0 : i32
    return %arg0, %c0_i32 : i32, i32
  }
}

</mosaic_0001>

<bundles_post_ra>
// kernel: tpu_custom_call.1
= control target key start
LH: loop header
LB: loop body
LE: loop exit
PB: predicated region body
PF: predicated region fallthrough
CT: control target
= control target key end

     0   :  { %8 = vsyncpa [#allocation3], 0  ;;  %v1213_v1 = vmov 0.0   ;;  %v1215_v2 = vmov 0.0   ;;  %s1217_s14 = smov 0   ;;  %s1412_s0 = inlined_call_operand.vmem [shape: bf16[2,18,16,9], index: 0, kind: input, shape index: {}]   ;;  %s1413_s1 = inlined_call_operand.vmem [shape: bf16[27,128], index: 1, kind: input, shape index: {}]   ;;  %s1414_s2 = inlined_call_operand.vmem [shape: f32[1,128], index: 2, kind: input, shape index: {}]   ;;  %s1415_s3 = inlined_call_operand.hbm [shape: f32[2,128], index: 3, kind: output, shape index: {}]  }
   0x1   :  { %v1211_v0 = vld [vmem:[%s1414_s2] ss:$0 sm:$0xff] }
   0x2 LB: > { %v1124_v3 = vld [vmem:[%s1413_s1 + $0x8] sm:$0x3f]   ;;  %vm573_vm0 = vcmask 1044480   ;;  %vm574_vm1 = vcmask 1045504   ;;  %s999_s16 = sshll.u32 %s1182_s14, 6  ;;  %v1184_v4 = vmov 65535   ;;  %s1182_s14 = sphi %s1217_s14, %s22_s14   ;;  %v1178_v2 = vphi %v1215_v2, %v1417_v2   ;;  %v1174_v1 = vphi %v1213_v1, %v1416_v1  }
   0x3   : > { %v575_v5 = vsel %vm573_vm0, 4294967295, %v1184_v4  ;;  %s1235_s19 = scalar_lea.vmem %s1412_s0, %s999_s16  ;;  %v1125_v7 = vld [vmem:[%s1413_s1] sm:$0xff]   ;;  %s1185_s22 = smov 9   ;;  %vm437_vm2 = vcmask 72704   ;;  %vm486_vm3 = vcmask 146432   ;;  %vm540_vm4 = vcmask 220160  }
   0x4   : > { %v576_v6 = vsel %vm574_vm1, %v575_v5, 0  ;;  %v1088_v8 = vld [vmem:[%s1235_s19 + $0x10] sm:$0xff]   ;;  %v1089_v10 = vld [vmem:[%s1235_s19 + $0x8] sm:$0xff]   ;;  %v1090_v11 = vld [vmem:[%s1235_s19 + $0xa0] sm:$0xff]   ;;  %s1186_s23 = smov 18   ;;  %s22_s14 = sadd.s32 1, %s1182_s14  }
   0x5   : > { %v578_v9 = vand.u32 %v1124_v3, %v576_v6  ;;  %295 = vrot.lane.b32.xlu1 %v1088_v8, %s1185_s22  ;;  %293 = vrot.lane.b32.xlu0 %v1089_v10, %s1185_s22  ;;  %v1091_v12 = vld [vmem:[%s1235_s19 + $0x98] sm:$0xff]   ;;  %v1092_v13 = vld [vmem:[%s1235_s19 + $0xa0] sm:$0xff]   ;;  %p19_p0 = scmp.ge.s32.totalorder %s22_s14, 2  }
   0x6   : > { %v1093_v14 = vld [vmem:[%s1235_s19 + $0x10] sm:$0xff]   ;;  %v1094_v15 = vld [vmem:[%s1235_s19 + $0xa8] sm:$0xff]   ;;  %v1095_v16 = vld [vmem:[%s1235_s19 + $0x18] sm:$0xff]   ;;  %vm821_vm5 = vcmask (%p19_p0), 1041409   ;;  %s1187_s24 = smov (%p19_p0), [#allocation2]  }
   0x7   : > { %1020 = vmatprep.subr.bf16.mxu0 %v578_v9  ;;  %1056 = vmatprep.subr.bf16.mxu1 %v578_v9  ;;  %v1096_v17 = vld [vmem:[%s1235_s19 + $0xa8] sm:$0xff]   ;;  %v1097_v18 = vld [vmem:[%s1235_s19 + $0x18] sm:$0xff]   ;;  %v1098_v19 = vld [vmem:[%s1235_s19 + $0xb0] sm:$0xff]   ;;  %s831_s25 = sshll.u32 (%p19_p0), %s1187_s24, 4  ;;  %s832_s25 = int_to_ptr.vmem [resolvable:$true] %s831_s25 }
   0x8   : > { %1021 = vmatpush3.bf16.msra.mxu0 %v578_v9  ;;  %1058 = vmatpush3.bf16.msra.mxu1 %v578_v9  ;;  %v1099_v20 = vld [vmem:[%s1235_s19 + $0x20] sm:$0xff]   ;;  %v1100_v21 = vld [vmem:[%s1235_s19 + $0xb0] sm:$0xff]   ;;  %v1102_v23 = vld [vmem:[%s1235_s19 + $0xb8] sm:$0xff]   ;;  %s1138_s26 = scalar_lea.vmem (%p19_p0), %s832_s25, 32  ;;  %p1143_p2 = scmp.lt.s32.totalorder (%p19_p0), %s832_s25, %s832_s25 }
   0x9   : > { %1022 = vmatprep.subr.bf16.mxu0 %v1125_v7  ;;  %1057 = vmatprep.subr.bf16.mxu1 %v1125_v7  ;;  %v1101_v22 = vld [vmem:[%s1235_s19 + $0x20] sm:$0xff]   ;;  %v1103_v24 = vld [vmem:[%s1235_s19 + $0x28] sm:$0xff]   ;;  %v1104_v25 = vld [vmem:[%s1235_s19 + $0xb8] sm:$0xff]   ;;  %p1139_p1 = scmp.ne.s32.totalorder (%p19_p0), %s832_s25, %s1138_s26  ;;  %p1144_p3 = scmp.lt.s32.totalorder (%p19_p0), %s1138_s26, %s1138_s26 }
   0xa   : > { %311 = vrot.lane.b32.xlu1 %v1090_v11, %s1185_s22  ;;  %309 = vrot.lane.b32.xlu0 %v1091_v12, %s1185_s22  ;;  %v1105_v26 = vld [vmem:[%s1235_s19 + $0x28] sm:$0xff]   ;;  %v1106_v27 = vld [vmem:[%s1235_s19 + $0xc0] sm:$0xff]  }
   0xb   : > { %v1107_v28 = vld [vmem:[%s1235_s19 + $0x30] sm:$0xff]   ;;  %v1108_v29 = vld [vmem:[%s1235_s19 + $0xc0] sm:$0xff]   ;;  %v1110_v31 = vld [vmem:[%s1235_s19 + $0xc8] sm:$0xff]   ;;  %p1145_p4 = por (%p19_p0), %p1144_p3, %p1143_p2 }
   0xc   : > { %1023 = vmatpush3.bf16.msra.mxu0 %v1125_v7  ;;  %1059 = vmatpush3.bf16.msra.mxu1 %v1125_v7  ;;  %v1109_v30 = vld [vmem:[%s1235_s19 + $0x30] sm:$0xff]   ;;  %v1111_v32 = vld [vmem:[%s1235_s19 + $0x38] sm:$0xff]   ;;  %v1112_v33 = vld [vmem:[%s1235_s19 + $0xc8] sm:$0xff]  }
   0xd   : > { %v1113_v34 = vld [vmem:[%s1235_s19 + $0x38] sm:$0xff]   ;;  %v1114_v35 = vld [vmem:[%s1235_s19 + $0xd0] sm:$0xff]   ;;  %v1115_v36 = vld [vmem:[%s1235_s19 + $0x40] sm:$0xff]   ;;  %p1146_p5 = pnand (%p19_p0), %p1145_p4, %p1139_p1 }
   0xe   : > { %421 = vrot.lane.b32.xlu1 %v1092_v13, %s1186_s23  ;;  %405 = vrot.lane.b32.xlu0 %v1093_v14, %s1186_s23  ;;  %v1116_v37 = vld [vmem:[%s1235_s19 + $0xd0] sm:$0xff]   ;;  %v1117_v38 = vld [vmem:[%s1235_s19 + $0x40] sm:$0xff]  }
   0xf   : > { %v1118_v39 = vld [vmem:[%s1235_s19 + $0xd8] sm:$0xff]   ;;  %v1119_v40 = vld [vmem:[%s1235_s19 + $0x48] sm:$0xff]   ;;  %v1123_v44 = vld [vmem:[%s1235_s19 + $0x90] sm:$0xff]  }
  0x10   : > { %v1121_v45 = vld [vmem:[%s1235_s19] sm:$0xff]   ;;  %v1122_v47 = vld [vmem:[%s1235_s19 + $0x98] sm:$0xff]   ;;  %v1120_v50 = vld [vmem:[%s1235_s19 + $0x8] sm:$0xff]  }
  0x11   : > { %v1126_v63 = vld [vmem:[%s1235_s19 + $0xa0] sm:$0xff]   ;;  %v1127_v4 = vld [vmem:[%s1235_s19 + $0x10] sm:$0xff]   ;;  %v1128_v7 = vld [vmem:[%s1235_s19 + $0xa8] sm:$0xff]  }
  0x12   : > { %423 = vrot.lane.b32.xlu1 %v1094_v15, %s1186_s23  ;;  %407 = vrot.lane.b32.xlu0 %v1095_v16, %s1186_s23  ;;  %v1129_v10 = vld [vmem:[%s1235_s19 + $0x18] sm:$0xff]  }
  0x16   : > { %313 = vrot.lane.b32.xlu1 %v1096_v17, %s1185_s22  ;;  %297 = vrot.lane.b32.xlu0 %v1097_v18, %s1185_s22 }
  0x1a   : > { %315 = vrot.lane.b32.xlu1 %v1098_v19, %s1185_s22  ;;  %299 = vrot.lane.b32.xlu0 %v1099_v20, %s1185_s22 }
  0x1e   : > { %425 = vrot.lane.b32.xlu1 %v1100_v21, %s1186_s23  ;;  %409 = vrot.lane.b32.xlu0 %v1101_v22, %s1186_s23  ;;  %v1130_v22 = vld [vmem:[%s1235_s19 + $0xb0] sm:$0xff]  }
  0x22   : > { %427 = vrot.lane.b32.xlu1 %v1102_v23, %s1186_s23  ;;  %411 = vrot.lane.b32.xlu0 %v1103_v24, %s1186_s23  ;;  %v1131_v24 = vld [vmem:[%s1235_s19 + $0x20] sm:$0xff]  }
  0x26   : > { %317 = vrot.lane.b32.xlu1 %v1104_v25, %s1185_s22  ;;  %301 = vrot.lane.b32.xlu0 %v1105_v26, %s1185_s22 }
  0x2a   : > { %319 = vrot.lane.b32.xlu1 %v1106_v27, %s1185_s22  ;;  %303 = vrot.lane.b32.xlu0 %v1107_v28, %s1185_s22  ;;  %v1132_v27 = vld [vmem:[%s1235_s19 + $0xb8] sm:$0xff]  }
  0x2e   : > { %429 = vrot.lane.b32.xlu1 %v1108_v29, %s1186_s23  ;;  %413 = vrot.lane.b32.xlu0 %v1109_v30, %s1186_s23  ;;  %v1133_v30 = vld [vmem:[%s1235_s19 + $0x28] sm:$0xff]  }
  0x32   : > { %431 = vrot.lane.b32.xlu1 %v1110_v31, %s1186_s23  ;;  %415 = vrot.lane.b32.xlu0 %v1111_v32, %s1186_s23 }
  0x36   : > { %321 = vrot.lane.b32.xlu1 %v1112_v33, %s1185_s22  ;;  %305 = vrot.lane.b32.xlu0 %v1113_v34, %s1185_s22 }
  0x3a   : > { %323 = vrot.lane.b32.xlu1 %v1114_v35, %s1185_s22  ;;  %307 = vrot.lane.b32.xlu0 %v1115_v36, %s1185_s22 }
  0x3e   : > { %433 = vrot.lane.b32.xlu1 %v1116_v37, %s1186_s23  ;;  %417 = vrot.lane.b32.xlu0 %v1117_v38, %s1186_s23 }
  0x42   : > { %435 = vrot.lane.b32.xlu1 %v1118_v39, %s1186_s23  ;;  %419 = vrot.lane.b32.xlu0 %v1119_v40, %s1186_s23 }
  0x77   : > { %v296_v41 = vpop.permute.xlu1 %295  ;;  %v294_v42 = vpop.permute.xlu0 %293 }
  0x78   : > { %v440_v51 = vsel %vm437_vm2, %v1121_v45, %v294_v42  ;;  %v443_v57 = vsel %vm437_vm2, %v1120_v50, %v296_v41  ;;  %v1134_v42 = vld [vmem:[%s1235_s19 + $0xc0] sm:$0xff]   ;;  %v1137_v50 = vld [vmem:[%s1235_s19 + $0x38] sm:$0xff]  }
  0x7c   : > { %v312_v43 = vpop.permute.xlu1 %311  ;;  %v310_v46 = vpop.permute.xlu0 %309 }
  0x7d   : > { %v464_v48 = vsel %vm437_vm2, %v1123_v44, %v310_v46  ;;  %v467_v55 = vsel %vm437_vm2, %v1122_v47, %v312_v43  ;;  %v1135_v44 = vld [vmem:[%s1235_s19 + $0x30] sm:$0xff]   ;;  %v1136_v47 = vld [vmem:[%s1235_s19 + $0xc8] sm:$0xff]  }
  0x80   : > { %v422_v49 = vpop.permute.xlu1 %421  ;;  %v406_v52 = vpop.permute.xlu0 %405 }
  0x81   : > { %v504_v53 = vsel %vm486_vm3, %v464_v48, %v422_v49  ;;  %v488_v54 = vsel %vm486_vm3, %v440_v51, %v406_v52 }
  0x82   : > { %1040 = vmatprep.mubr.msk.bf16.mxu1 %vm540_vm4, %v504_v53  ;;  %1024 = vmatprep.mubr.msk.bf16.mxu0 %vm540_vm4, %v488_v54 }
  0x84   : > { %v424_v56 = vpop.permute.xlu1 %423  ;;  %v408_v59 = vpop.permute.xlu0 %407 }
  0x85   : > { %v506_v58 = vsel %vm486_vm3, %v467_v55, %v424_v56  ;;  %v490_v60 = vsel %vm486_vm3, %v443_v57, %v408_v59 }
  0x86   : > { %1041 = vmatmul.mubr.msk.bf16.vlgmr.msra.gmra.mxu1 %vm540_vm4, %v506_v58  ;;  %1025 = vmatmul.mubr.msk.bf16.vlgmr.msra.gmra.mxu0 %vm540_vm4, %v490_v60 }
  0x88   : > { %v314_v61 = vpop.permute.xlu1 %313  ;;  %v298_v62 = vpop.permute.xlu0 %297 }
  0x89   : > { %v470_v6 = vsel %vm437_vm2, %v1126_v63, %v314_v61  ;;  %v446_v9 = vsel %vm437_vm2, %v1127_v4, %v298_v62 }
  0x8c   : > { %v316_v3 = vpop.permute.xlu1 %315  ;;  %v300_v5 = vpop.permute.xlu0 %299 }
  0x8d   : > { %v473_v14 = vsel %vm437_vm2, %v1128_v7, %v316_v3  ;;  %v449_v16 = vsel %vm437_vm2, %v1129_v10, %v300_v5 }
  0x90   : > { %v426_v8 = vpop.permute.xlu1 %425  ;;  %v410_v12 = vpop.permute.xlu0 %409 }
  0x91   : > { %v508_v11 = vsel %vm486_vm3, %v470_v6, %v426_v8  ;;  %v492_v13 = vsel %vm486_vm3, %v446_v9, %v410_v12 }
  0x92   : > { %1044 = vmatprep.mubr.msk.bf16.mxu1 %vm540_vm4, %v508_v11  ;;  %1028 = vmatprep.mubr.msk.bf16.mxu0 %vm540_vm4, %v492_v13 }
  0x94   : > { %v428_v15 = vpop.permute.xlu1 %427  ;;  %v412_v18 = vpop.permute.xlu0 %411 }
  0x95   : > { %v510_v17 = vsel %vm486_vm3, %v473_v14, %v428_v15  ;;  %v494_v19 = vsel %vm486_vm3, %v449_v16, %v412_v18 }
  0x96   : > { %1045 = vmatmul.mubr.msk.bf16.gmra.mxu1 %vm540_vm4, %v510_v17  ;;  %1029 = vmatmul.mubr.msk.bf16.gmra.mxu0 %vm540_vm4, %v494_v19 }
  0x98   : > { %v318_v20 = vpop.permute.xlu1 %317  ;;  %v302_v21 = vpop.permute.xlu0 %301 }
  0x99   : > { %v476_v26 = vsel %vm437_vm2, %v1130_v22, %v318_v20  ;;  %v452_v29 = vsel %vm437_vm2, %v1131_v24, %v302_v21 }
  0x9c   : > { %v320_v23 = vpop.permute.xlu1 %319  ;;  %v304_v25 = vpop.permute.xlu0 %303 }
  0x9d   : > { %v479_v34 = vsel %vm437_vm2, %v1132_v27, %v320_v23  ;;  %v455_v36 = vsel %vm437_vm2, %v1133_v30, %v304_v25 }
  0xa0   : > { %v430_v28 = vpop.permute.xlu1 %429  ;;  %v414_v32 = vpop.permute.xlu0 %413 }
  0xa1   : > { %v512_v31 = vsel %vm486_vm3, %v476_v26, %v430_v28  ;;  %v496_v33 = vsel %vm486_vm3, %v452_v29, %v414_v32 }
  0xa2   : > { %1048 = vmatprep.mubr.msk.bf16.mxu1 %vm540_vm4, %v512_v31  ;;  %1032 = vmatprep.mubr.msk.bf16.mxu0 %vm540_vm4, %v496_v33 }
  0xa4   : > { %v432_v35 = vpop.permute.xlu1 %431  ;;  %v416_v38 = vpop.permute.xlu0 %415 }
  0xa5   : > { %v514_v37 = vsel %vm486_vm3, %v479_v34, %v432_v35  ;;  %v498_v39 = vsel %vm486_vm3, %v455_v36, %v416_v38 }
  0xa6   : > { %1049 = vmatmul.mubr.msk.bf16.gmra.mxu1 %vm540_vm4, %v514_v37  ;;  %1033 = vmatmul.mubr.msk.bf16.gmra.mxu0 %vm540_vm4, %v498_v39 }
  0xa8   : > { %v322_v40 = vpop.permute.xlu1 %321  ;;  %v306_v41 = vpop.permute.xlu0 %305 }
  0xa9   : > { %v482_v46 = vsel %vm437_vm2, %v1134_v42, %v322_v40  ;;  %v458_v49 = vsel %vm437_vm2, %v1135_v44, %v306_v41 }
  0xac   : > { %v324_v43 = vpop.permute.xlu1 %323  ;;  %v308_v45 = vpop.permute.xlu0 %307 }
  0xad   : > { %v485_v54 = vsel %vm437_vm2, %v1136_v47, %v324_v43  ;;  %v461_v56 = vsel %vm437_vm2, %v1137_v50, %v308_v45 }
  0xb0   : > { %v434_v48 = vpop.permute.xlu1 %433  ;;  %v418_v52 = vpop.permute.xlu0 %417 }
  0xb1   : > { %v516_v51 = vsel %vm486_vm3, %v482_v46, %v434_v48  ;;  %v500_v53 = vsel %vm486_vm3, %v458_v49, %v418_v52 }
  0xb2   : > { %1052 = vmatprep.mubr.msk.bf16.mxu1 %vm540_vm4, %v516_v51  ;;  %1036 = vmatprep.mubr.msk.bf16.mxu0 %vm540_vm4, %v500_v53 }
  0xb4   : > { %v436_v55 = vpop.permute.xlu1 %435  ;;  %v420_v58 = vpop.permute.xlu0 %419 }
  0xb5   : > { %v518_v57 = vsel %vm486_vm3, %v485_v54, %v436_v55  ;;  %v502_v59 = vsel %vm486_vm3, %v461_v56, %v420_v58 }
  0xb6   : > { %1053 = vmatmul.mubr.msk.bf16.gmra.mxu1 %vm540_vm4, %v518_v57  ;;  %1037 = vmatmul.mubr.msk.bf16.gmra.mxu0 %vm540_vm4, %v502_v59 }
 0x146   : > { %v1042_v60 = vpop.f32.mrf.mxu1  ;;  %v1026_v61 = vpop.f32.mrf.mxu0 }
 0x147   : > { %v687_v18 = vadd.f32 %v1042_v60, %v1211_v0  ;;  %v623_v21 = vadd.f32 %v1026_v61, %v1211_v0 }
 0x148   : > { %v678_v62 = vpop.f32.mrf.mxu1  ;;  %v614_v63 = vpop.f32.mrf.mxu0 }
 0x149   : > { %v679_v10 = vadd.f32 %v1211_v0, %v678_v62  ;;  %v615_v12 = vadd.f32 %v1211_v0, %v614_v63  ;;  %v759_v26 = vmax.f32 %v687_v18, 0.0  ;;  %v743_v30 = vmax.f32 %v623_v21, 0.0 }
 0x14a   : > { %v1043_v3 = vpop.f32.mrf.mxu1  ;;  %v1027_v4 = vpop.f32.mrf.mxu0 }
 0x14b   : > { %v757_v19 = vmax.f32 %v679_v10, 0.0  ;;  %v741_v22 = vmax.f32 %v615_v12, 0.0  ;;  %v690_v27 = vadd.f32 %v1043_v3, %v1211_v0  ;;  %v626_v31 = vadd.f32 %v1027_v4, %v1211_v0 }
 0x14c   : > { %v681_v5 = vpop.f32.mrf.mxu1  ;;  %v617_v6 = vpop.f32.mrf.mxu0 }
 0x14d   : > { %v682_v7 = vadd.f32 %v1211_v0, %v681_v5  ;;  %v618_v8 = vadd.f32 %v1211_v0, %v617_v6  ;;  %v760_v37 = vmax.f32 %v690_v27, 0.0  ;;  %v744_v39 = vmax.f32 %v626_v31, 0.0 }
 0x14f   : > { %v758_v14 = vmax.f32 %v682_v7, 0.0  ;;  %v742_v16 = vmax.f32 %v618_v8, 0.0 }
 0x151   : > { %v794_v23 = vadd.f32 %v758_v14, %v757_v19  ;;  %v773_v24 = vadd.f32 %v742_v16, %v741_v22 }
 0x153   : > { %v795_v33 = vadd.f32 %v794_v23, %v759_v26  ;;  %v774_v35 = vadd.f32 %v773_v24, %v743_v30 }
 0x155   : > { %v796_v41 = vadd.f32 %v795_v33, %v760_v37  ;;  %v775_v43 = vadd.f32 %v774_v35, %v744_v39 }
 0x156   : > { %v1046_v9 = vpop.f32.mrf.mxu1  ;;  %v1030_v11 = vpop.f32.mrf.mxu0 }
 0x157   : > { %v703_v46 = vadd.f32 %v1046_v9, %v1211_v0  ;;  %v639_v49 = vadd.f32 %v1030_v11, %v1211_v0 }
 0x158   : > { %v694_v13 = vpop.f32.mrf.mxu1  ;;  %v630_v15 = vpop.f32.mrf.mxu0 }
 0x159   : > { %v695_v28 = vadd.f32 %v1211_v0, %v694_v13  ;;  %v631_v32 = vadd.f32 %v1211_v0, %v630_v15  ;;  %v763_v56 = vmax.f32 %v703_v46, 0.0  ;;  %v747_v60 = vmax.f32 %v639_v49, 0.0 }
 0x15a   : > { %v1047_v17 = vpop.f32.mrf.mxu1  ;;  %v1031_v20 = vpop.f32.mrf.mxu0 }
 0x15b   : > { %v761_v38 = vmax.f32 %v695_v28, 0.0  ;;  %v745_v40 = vmax.f32 %v631_v32, 0.0  ;;  %v706_v57 = vadd.f32 %v1047_v17, %v1211_v0  ;;  %v642_v61 = vadd.f32 %v1031_v20, %v1211_v0 }
 0x15c   : > { %v697_v25 = vpop.f32.mrf.mxu1  ;;  %v633_v29 = vpop.f32.mrf.mxu0 }
 0x15d   : > { %v698_v34 = vadd.f32 %v1211_v0, %v697_v25  ;;  %v634_v36 = vadd.f32 %v1211_v0, %v633_v29  ;;  %v797_v47 = vadd.f32 %v796_v41, %v761_v38  ;;  %v776_v50 = vadd.f32 %v775_v43, %v745_v40 }
 0x15e   : > { %v764_v8 = vmax.f32 %v706_v57, 0.0  ;;  %v748_v10 = vmax.f32 %v642_v61, 0.0 }
 0x15f   : > { %v762_v42 = vmax.f32 %v698_v34, 0.0  ;;  %v746_v44 = vmax.f32 %v634_v36, 0.0 }
 0x161   : > { %v798_v52 = vadd.f32 %v797_v47, %v762_v42  ;;  %v777_v54 = vadd.f32 %v776_v50, %v746_v44 }
 0x163   : > { %v799_v3 = vadd.f32 %v798_v52, %v763_v56  ;;  %v778_v6 = vadd.f32 %v777_v54, %v747_v60 }
 0x165   : > { %v800_v12 = vadd.f32 %v799_v3, %v764_v8  ;;  %v779_v14 = vadd.f32 %v778_v6, %v748_v10 }
 0x166   : > { %v1050_v45 = vpop.f32.mrf.mxu1  ;;  %v1034_v48 = vpop.f32.mrf.mxu0 }
 0x167   : > { %v719_v16 = vadd.f32 %v1050_v45, %v1211_v0  ;;  %v655_v18 = vadd.f32 %v1034_v48, %v1211_v0 }
 0x168   : > { %v710_v51 = vpop.f32.mrf.mxu1  ;;  %v646_v53 = vpop.f32.mrf.mxu0 }
 0x169   : > { %v711_v58 = vadd.f32 %v1211_v0, %v710_v51  ;;  %v647_v62 = vadd.f32 %v1211_v0, %v646_v53  ;;  %v767_v23 = vmax.f32 %v719_v16, 0.0  ;;  %v751_v26 = vmax.f32 %v655_v18, 0.0 }
 0x16a   : > { %v1051_v55 = vpop.f32.mrf.mxu1  ;;  %v1035_v59 = vpop.f32.mrf.mxu0 }
 0x16b   : > { %v765_v9 = vmax.f32 %v711_v58, 0.0  ;;  %v749_v11 = vmax.f32 %v647_v62, 0.0  ;;  %v722_v24 = vadd.f32 %v1051_v55, %v1211_v0  ;;  %v658_v27 = vadd.f32 %v1035_v59, %v1211_v0 }
 0x16c   : > { %v713_v63 = vpop.f32.mrf.mxu1  ;;  %v649_v4 = vpop.f32.mrf.mxu0 }
 0x16d   : > { %v714_v5 = vadd.f32 %v1211_v0, %v713_v63  ;;  %v650_v7 = vadd.f32 %v1211_v0, %v649_v4  ;;  %v801_v17 = vadd.f32 %v800_v12, %v765_v9  ;;  %v780_v19 = vadd.f32 %v779_v14, %v749_v11 }
 0x16e   : > { %v768_v35 = vmax.f32 %v722_v24, 0.0  ;;  %v752_v38 = vmax.f32 %v658_v27, 0.0 }
 0x16f   : > { %v766_v13 = vmax.f32 %v714_v5, 0.0  ;;  %v750_v15 = vmax.f32 %v650_v7, 0.0 }
 0x171   : > { %v802_v20 = vadd.f32 %v801_v17, %v766_v13  ;;  %v781_v21 = vadd.f32 %v780_v19, %v750_v15 }
 0x173   : > { %v803_v29 = vadd.f32 %v802_v20, %v767_v23  ;;  %v782_v32 = vadd.f32 %v781_v21, %v751_v26 }
 0x175   : > { %v804_v42 = vadd.f32 %v803_v29, %v768_v35  ;;  %v783_v46 = vadd.f32 %v782_v32, %v752_v38 }
 0x176   : > { %v1054_v22 = vpop.f32.mrf.mxu1  ;;  %v1038_v25 = vpop.f32.mrf.mxu0 }
 0x177   : > { %v735_v41 = vadd.f32 %v1054_v22, %v1211_v0  ;;  %v671_v45 = vadd.f32 %v1038_v25, %v1211_v0 }
 0x178   : > { %v726_v28 = vpop.f32.mrf.mxu1  ;;  %v662_v30 = vpop.f32.mrf.mxu0 }
 0x179   : > { %v727_v31 = vadd.f32 %v1211_v0, %v726_v28  ;;  %v663_v33 = vadd.f32 %v1211_v0, %v662_v30  ;;  %v771_v54 = vmax.f32 %v735_v41, 0.0  ;;  %v755_v56 = vmax.f32 %v671_v45, 0.0 }
 0x17a   : > { %v1055_v34 = vpop.f32.mrf.mxu1  ;;  %v1039_v37 = vpop.f32.mrf.mxu0 }
 0x17b   : > { %v769_v36 = vmax.f32 %v727_v31, 0.0  ;;  %v753_v39 = vmax.f32 %v663_v33, 0.0  ;;  %v738_v49 = vadd.f32 %v1055_v34, %v1211_v0  ;;  %v674_v52 = vadd.f32 %v1039_v37, %v1211_v0 }
 0x17c   : > { %v729_v40 = vpop.f32.mrf.mxu1  ;;  %v665_v43 = vpop.f32.mrf.mxu0 }
 0x17d   : > { %v730_v44 = vadd.f32 %v1211_v0, %v729_v40  ;;  %v666_v47 = vadd.f32 %v1211_v0, %v665_v43  ;;  %v805_v48 = vadd.f32 %v804_v42, %v769_v36  ;;  %v784_v51 = vadd.f32 %v783_v46, %v753_v39 }
 0x17e   : > { %v772_v58 = vmax.f32 %v738_v49, 0.0  ;;  %v756_v60 = vmax.f32 %v674_v52, 0.0 }
 0x17f   : > { %v770_v50 = vmax.f32 %v730_v44, 0.0  ;;  %v754_v53 = vmax.f32 %v666_v47, 0.0 }
 0x181   : > { %v806_v55 = vadd.f32 %v805_v48, %v770_v50  ;;  %v785_v57 = vadd.f32 %v784_v51, %v754_v53 }
 0x183   : > { %v807_v59 = vadd.f32 %v806_v55, %v771_v54  ;;  %v786_v61 = vadd.f32 %v785_v57, %v755_v56 }
 0x185   : > { %v808_v62 = vadd.f32 %v807_v59, %v772_v58  ;;  %v787_v63 = vadd.f32 %v786_v61, %v756_v60 }
 0x187   : > { %v809_v3 = vrot.slane %v808_v62, 4  ;;  %v788_v4 = vrot.slane %v787_v63, 4 }
 0x189   : > { %v810_v5 = vadd.f32 %v809_v3, %v808_v62  ;;  %v789_v6 = vadd.f32 %v788_v4, %v787_v63 }
 0x18b   : > { %v811_v7 = vrot.slane %v810_v5, 2  ;;  %v790_v8 = vrot.slane %v789_v6, 2 }
 0x18d   : > { %v812_v9 = vadd.f32 %v811_v7, %v810_v5  ;;  %v791_v10 = vadd.f32 %v790_v8, %v789_v6 }
 0x18f   : > { %v813_v11 = vrot.slane %v812_v9, 1  ;;  %v792_v12 = vrot.slane %v791_v10, 1 }
 0x191   : > { %v814_v13 = vadd.f32 %v813_v11, %v812_v9  ;;  %v793_v14 = vadd.f32 %v792_v12, %v791_v10  ;;  %21 = sbr.rel (!%p19_p0) target bundleno = 2 (0x2), region = 42 }
 0x193   : > { %v816_v15 = vadd.f32 %v1174_v1, %v814_v13   ;;  %v815_v16 = vadd.f32 %v1178_v2, %v793_v14  }
 0x195   : > { %v1416_v1 = vmov %v816_v15  ;;  %v1417_v2 = vmov %v815_v16  ;;  %v817_v17 = vmul.f32 (%p19_p0), 0.00390625, %v815_v16  ;;  %v818_v18 = vmul.f32 (%p19_p0), 0.00390625, %v816_v15 }
 0x197   :  { %v822_v19 = vsel %vm821_vm5, %v818_v18, %v817_v17 }
 0x198   :  { %824 = vst [vmem:[#allocation2] sm:$0x3] %v822_v19 }
 0x199   :  { %1149 = shalt.err (!%p1146_p5)
}
 0x19a   :  { %834 = dma.vmem_to_hbm [thread:$0]  %s832_s25, 32, %s1415_s3, [#allocation3]  }
 0x19b   :  { %1170 = dma.done.wait [#allocation3], 32  }
 0x19c   :  { %1171 = vsyncadd [#allocation3], 4294967264 }
 0x19d   :  { %838 = vsyncpa [#allocation3], 1 }

</bundles_post_ra>
